<compile_context>
chip_gen: v7x
topology: tpu7x:2x2x1
jax: 0.10.0
libtpu: 0.0.40
codegen_flags: <defaults>
</compile_context>

<pallas_src>
import functools
import math

import jax
import jax.numpy as jnp
from jax.experimental import pallas as pl
from jax.experimental.pallas import tpu as pltpu

NUM_LAYERS = 8


def _round_up(x, m):
    return ((x + m - 1) // m) * m


def mapping_kernel(x_ref, w_ref, b_ref, o_ref, *, d_true, num_layers):
    # x_ref: (TM, Dp) f32   w_ref: (L, Dp, Dp) bf16 (c pre-folded)
    # b_ref: (L, Dp) f32    o_ref: (TM, Dp) f32
    x_f32 = x_ref[...]

    # Pixel norm over the *true* feature dim (padded lanes are zero, so the
    # lane sum over Dp equals the sum over the D real features).  Note:
    # all-zero padded batch rows hit rsqrt(1e-8) ~ 1e4 here; this is harmless
    # (it multiplies zero and those rows are sliced off on the host) -- do not
    # "fix" it into a NaN guard.
    ss = jnp.sum(x_f32 * x_f32, axis=1, keepdims=True)            # (TM, 1)
    inv = jax.lax.rsqrt(ss * jnp.float32(1.0 / d_true) + jnp.float32(1e-8))

    # bf16 activation carry: only the MXU consumes it; accumulation, bias add
    # and ReLU stay f32 (keeps v5e's f32-only VPU path happy).
    x = (x_f32 * inv).astype(jnp.bfloat16)

    for l in range(num_layers):
        acc = jnp.dot(x, w_ref[l], preferred_element_type=jnp.float32)
        acc = acc + b_ref[pl.ds(l, 1), :]                          # (1, Dp) f32
        if l < num_layers - 1:
            x = jnp.maximum(acc, 0.0).astype(jnp.bfloat16)         # ReLU -> bf16 carry
        else:
            o_ref[...] = acc.astype(o_ref.dtype)                   # last layer: no ReLU


def prepare_mapping_params(w_stack, b_stack):
    """One-time parameter prep (call at load time, NOT per forward).

    Folds the EqualizedWeight scale c = 1/sqrt(D) into the weights in f32
    (single bf16 rounding afterwards), pads the feature dim to a lane-dense
    multiple of 128, and casts weights to bf16.
      w_stack: (L, D, D) with w_stack[l] = W_l^T (in, out)
      b_stack: (L, D) or (L, 1, D)
    """
    L, D, _ = w_stack.shape
    b_stack = jnp.reshape(b_stack, (L, D))
    Dp = _round_up(max(D, 128), 128)

    c = jnp.float32(1.0 / math.sqrt(D))
    w_scaled = w_stack.astype(jnp.float32) * c                     # f32 mul first
    w_p = jnp.zeros((L, Dp, Dp), jnp.bfloat16).at[:, :D, :D].set(
        w_scaled.astype(jnp.bfloat16))
    b_p = jnp.zeros((L, Dp), jnp.float32).at[:, :D].set(b_stack.astype(jnp.float32))
    return w_p, b_p, D


def _choose_tm(batch, tm_max=256):
    """Batch-tile rows: f32 sublane multiple of 8, no padding tiny batches to a
    full 128/256-row tile, and >= 2 grid steps whenever each step still gets
    >= 8 real rows (so v7x's two TensorCores both get work)."""
    bp8 = _round_up(max(batch, 1), 8)
    if bp8 < 16:
        return bp8                                   # single tiny tile
    if bp8 <= 2 * tm_max:
        return _round_up((bp8 + 1) // 2, 8)          # exactly two tiles
    return tm_max


def mapping_network(x, w_p, b_p, d_true, *, tm_max=256):
    """x: (B, D) f32; w_p/b_p/d_true from prepare_mapping_params()."""
    B, D = x.shape
    assert D == d_true, "z_dim must equal w_dim for this mapping network"
    L, Dp, _ = w_p.shape

    tm = _choose_tm(B, tm_max)
    Bp = _round_up(max(B, 1), tm)
    grid = (Bp // tm,)

    x_p = jnp.zeros((Bp, Dp), jnp.float32).at[:B, :D].set(x.astype(jnp.float32))

    kernel = functools.partial(mapping_kernel, d_true=d_true, num_layers=L)

    # The weight/bias blocks have a constant index_map, so they stay resident
    # across batch tiles; the auto-pipeliner still double-buffers them, so
    # raise the scoped VMEM limit when that would exceed the conservative
    # default (16 MiB on v5e).
    resident_bytes = 2 * (L * Dp * Dp * 2) + 2 * (L * Dp * 4)      # w + b, 2 bufs
    io_bytes = 2 * 2 * (tm * Dp * 4)                               # x + out, 2 bufs
    need_bytes = resident_bytes + io_bytes + (4 << 20)             # + scratch slack
    compiler_kwargs = dict(dimension_semantics=("parallel",))
    if need_bytes > (12 << 20):
        compiler_kwargs["vmem_limit_bytes"] = int(min(need_bytes, 120 << 20))

    out = pl.pallas_call(
        kernel,
        out_shape=jax.ShapeDtypeStruct((Bp, Dp), jnp.float32),
        grid=grid,
        in_specs=[
            pl.BlockSpec((tm, Dp), lambda i: (i, 0)),              # x: one batch tile
            pl.BlockSpec((L, Dp, Dp), lambda i: (0, 0, 0)),        # weights: resident
            pl.BlockSpec((L, Dp), lambda i: (0, 0)),               # bias: resident
        ],
        out_specs=pl.BlockSpec((tm, Dp), lambda i: (i, 0)),
        compiler_params=pltpu.CompilerParams(**compiler_kwargs),
    )(x_p, w_p, b_p)

    return out[:B, :D]


def mapping_network_ref(x, w_stack, b_stack):
    """Pure-JAX f32 reference implementing the original module's math."""
    L, D = w_stack.shape[0], x.shape[1]
    b_stack = jnp.reshape(b_stack, (L, D))
    c = 1.0 / math.sqrt(D)
    x = x / jnp.sqrt(jnp.mean(x * x, axis=1, keepdims=True) + 1e-8)
    for l in range(L):
        x = x @ (w_stack[l] * c) + b_stack[l][None, :]
        if l < L - 1:
            x = jnp.maximum(x, 0.0)
    return x


if __name__ == "__main__":
    # Small shapes: z_dim == w_dim (the module implicitly requires this).
    B, D = 8, 32

    key = jax.random.PRNGKey(0)
    kx, kw = jax.random.split(key, 2)

    x = jax.random.normal(kx, (B, D), dtype=jnp.float32)

    # EqualizedLinear params: weight ~ N(0,1) of shape (out, in), bias = 0.0.
    # Store weights pre-transposed: w_stack[l] = W_l^T with shape (in, out).
    w_raw = jax.random.normal(kw, (NUM_LAYERS, D, D), dtype=jnp.float32)   # (L, out, in)
    w_stack = jnp.transpose(w_raw, (0, 2, 1))                              # (L, in, out)
    b_stack = jnp.zeros((NUM_LAYERS, D), dtype=jnp.float32)

    # One-time parameter prep (hoisted out of the per-call forward path).
    w_p, b_p, d_true = prepare_mapping_params(w_stack, b_stack)
    w_p, b_p = jax.block_until_ready((w_p, b_p))

    out = mapping_network(x, w_p, b_p, d_true)
    out = jax.block_until_ready(out)

    ref = mapping_network_ref(x, w_stack, b_stack)
    assert out.shape == (B, D)
    # Weights/activations feed the MXU as bf16 with f32 accumulation across 8
    # stacked layers, so the tolerance vs the pure-f32 reference is loosened.
    assert jnp.allclose(out, ref, atol=3e-2, rtol=3e-2), "mismatch vs reference"

    print("KERNEL_OK")
</pallas_src>

<mosaic_0001>
module attributes {stable_mosaic.version = 11 : i64} {
  func.func @mapping_kernel(%arg0: i32, %arg1: memref<8x128xf32, #tpu.memory_space<vmem>>, %arg2: memref<8x128x128xbf16, #tpu.memory_space<vmem>>, %arg3: memref<8x128xf32, #tpu.memory_space<vmem>>, %arg4: memref<8x128xf32, #tpu.memory_space<vmem>>) attributes {dimension_semantics = [#tpu.dimension_semantics<parallel>], iteration_bounds = array<i64: 1>, scalar_prefetch = 0 : i64, scratch_operands = 0 : i64, tpu.core_type = #tpu.core_type<tc>, window_params = [{transform_indices = @transform_0, window_bounds = array<i64: 8, 128>}, {pipeline_mode = #tpu.pipeline_mode<synchronous>, transform_indices = @transform_1, window_bounds = array<i64: 8, 128, 128>}, {pipeline_mode = #tpu.pipeline_mode<synchronous>, transform_indices = @transform_2, window_bounds = array<i64: 8, 128>}, {transform_indices = @transform_3, window_bounds = array<i64: 8, 128>}]} {
    %c0 = arith.constant 0 : index
    %c0_0 = arith.constant 0 : index
    %0 = vector.load %arg1[%c0, %c0_0] : memref<8x128xf32, #tpu.memory_space<vmem>>, vector<8x128xf32>
    %1 = arith.mulf %0, %0 : vector<8x128xf32>
    %cst = arith.constant dense<0.000000e+00> : vector<8xf32>
    %2 = vector.multi_reduction <add>, %1, %cst [1] : vector<8x128xf32> to vector<8xf32>
    %3 = vector.shape_cast %2 : vector<8xf32> to vector<8x1xf32>
    %cst_1 = arith.constant 3.125000e-02 : f32
    %4 = vector.broadcast %cst_1 : f32 to vector<8x1xf32>
    %5 = arith.mulf %3, %4 : vector<8x1xf32>
    %cst_2 = arith.constant 9.99999993E-9 : f32
    %6 = vector.broadcast %cst_2 : f32 to vector<8x1xf32>
    %7 = arith.addf %5, %6 : vector<8x1xf32>
    %8 = math.rsqrt %7 : vector<8x1xf32>
    %9 = vector.broadcast %8 : vector<8x1xf32> to vector<8x128xf32>
    %10 = arith.mulf %0, %9 : vector<8x128xf32>
    %11 = arith.truncf %10 : vector<8x128xf32> to vector<8x128xbf16>
    %c0_3 = arith.constant 0 : index
    %c0_4 = arith.constant 0 : index
    %c0_5 = arith.constant 0 : index
    %12 = vector.load %arg2[%c0_3, %c0_4, %c0_5] : memref<8x128x128xbf16, #tpu.memory_space<vmem>>, vector<1x128x128xbf16>
    %13 = vector.shape_cast %12 : vector<1x128x128xbf16> to vector<128x128xbf16>
    %cst_6 = arith.constant dense<0.000000e+00> : vector<8x128xf32>
    %14 = tpu.matmul %11, %13, %cst_6 {dimension_numbers = #tpu.dot_dimension_numbers<[1], [0], [0], [1], [0, 0, 1, 1], [], []>} : vector<8x128xbf16>, vector<128x128xbf16>, vector<8x128xf32> -> vector<8x128xf32>
    %c0_7 = arith.constant 0 : index
    %c0_8 = arith.constant 0 : index
    %15 = vector.load %arg3[%c0_7, %c0_8] : memref<8x128xf32, #tpu.memory_space<vmem>>, vector<1x128xf32>
    %16 = vector.broadcast %15 : vector<1x128xf32> to vector<8x128xf32>
    %17 = arith.addf %14, %16 : vector<8x128xf32>
    %cst_9 = arith.constant 0.000000e+00 : f32
    %18 = vector.broadcast %cst_9 : f32 to vector<8x128xf32>
    %19 = arith.maximumf %17, %18 : vector<8x128xf32>
    %20 = arith.truncf %19 : vector<8x128xf32> to vector<8x128xbf16>
    %c1 = arith.constant 1 : index
    %c0_10 = arith.constant 0 : index
    %c0_11 = arith.constant 0 : index
    %21 = vector.load %arg2[%c1, %c0_10, %c0_11] : memref<8x128x128xbf16, #tpu.memory_space<vmem>>, vector<1x128x128xbf16>
    %22 = vector.shape_cast %21 : vector<1x128x128xbf16> to vector<128x128xbf16>
    %cst_12 = arith.constant dense<0.000000e+00> : vector<8x128xf32>
    %23 = tpu.matmul %20, %22, %cst_12 {dimension_numbers = #tpu.dot_dimension_numbers<[1], [0], [0], [1], [0, 0, 1, 1], [], []>} : vector<8x128xbf16>, vector<128x128xbf16>, vector<8x128xf32> -> vector<8x128xf32>
    %c1_13 = arith.constant 1 : index
    %c0_14 = arith.constant 0 : index
    %24 = vector.load %arg3[%c1_13, %c0_14] : memref<8x128xf32, #tpu.memory_space<vmem>>, vector<1x128xf32>
    %25 = vector.broadcast %24 : vector<1x128xf32> to vector<8x128xf32>
    %26 = arith.addf %23, %25 : vector<8x128xf32>
    %cst_15 = arith.constant 0.000000e+00 : f32
    %27 = vector.broadcast %cst_15 : f32 to vector<8x128xf32>
    %28 = arith.maximumf %26, %27 : vector<8x128xf32>
    %29 = arith.truncf %28 : vector<8x128xf32> to vector<8x128xbf16>
    %c2 = arith.constant 2 : index
    %c0_16 = arith.constant 0 : index
    %c0_17 = arith.constant 0 : index
    %30 = vector.load %arg2[%c2, %c0_16, %c0_17] : memref<8x128x128xbf16, #tpu.memory_space<vmem>>, vector<1x128x128xbf16>
    %31 = vector.shape_cast %30 : vector<1x128x128xbf16> to vector<128x128xbf16>
    %cst_18 = arith.constant dense<0.000000e+00> : vector<8x128xf32>
    %32 = tpu.matmul %29, %31, %cst_18 {dimension_numbers = #tpu.dot_dimension_numbers<[1], [0], [0], [1], [0, 0, 1, 1], [], []>} : vector<8x128xbf16>, vector<128x128xbf16>, vector<8x128xf32> -> vector<8x128xf32>
    %c2_19 = arith.constant 2 : index
    %c0_20 = arith.constant 0 : index
    %33 = vector.load %arg3[%c2_19, %c0_20] : memref<8x128xf32, #tpu.memory_space<vmem>>, vector<1x128xf32>
    %34 = vector.broadcast %33 : vector<1x128xf32> to vector<8x128xf32>
    %35 = arith.addf %32, %34 : vector<8x128xf32>
    %cst_21 = arith.constant 0.000000e+00 : f32
    %36 = vector.broadcast %cst_21 : f32 to vector<8x128xf32>
    %37 = arith.maximumf %35, %36 : vector<8x128xf32>
    %38 = arith.truncf %37 : vector<8x128xf32> to vector<8x128xbf16>
    %c3 = arith.constant 3 : index
    %c0_22 = arith.constant 0 : index
    %c0_23 = arith.constant 0 : index
    %39 = vector.load %arg2[%c3, %c0_22, %c0_23] : memref<8x128x128xbf16, #tpu.memory_space<vmem>>, vector<1x128x128xbf16>
    %40 = vector.shape_cast %39 : vector<1x128x128xbf16> to vector<128x128xbf16>
    %cst_24 = arith.constant dense<0.000000e+00> : vector<8x128xf32>
    %41 = tpu.matmul %38, %40, %cst_24 {dimension_numbers = #tpu.dot_dimension_numbers<[1], [0], [0], [1], [0, 0, 1, 1], [], []>} : vector<8x128xbf16>, vector<128x128xbf16>, vector<8x128xf32> -> vector<8x128xf32>
    %c3_25 = arith.constant 3 : index
    %c0_26 = arith.constant 0 : index
    %42 = vector.load %arg3[%c3_25, %c0_26] : memref<8x128xf32, #tpu.memory_space<vmem>>, vector<1x128xf32>
    %43 = vector.broadcast %42 : vector<1x128xf32> to vector<8x128xf32>
    %44 = arith.addf %41, %43 : vector<8x128xf32>
    %cst_27 = arith.constant 0.000000e+00 : f32
    %45 = vector.broadcast %cst_27 : f32 to vector<8x128xf32>
    %46 = arith.maximumf %44, %45 : vector<8x128xf32>
    %47 = arith.truncf %46 : vector<8x128xf32> to vector<8x128xbf16>
    %c4 = arith.constant 4 : index
    %c0_28 = arith.constant 0 : index
    %c0_29 = arith.constant 0 : index
    %48 = vector.load %arg2[%c4, %c0_28, %c0_29] : memref<8x128x128xbf16, #tpu.memory_space<vmem>>, vector<1x128x128xbf16>
    %49 = vector.shape_cast %48 : vector<1x128x128xbf16> to vector<128x128xbf16>
    %cst_30 = arith.constant dense<0.000000e+00> : vector<8x128xf32>
    %50 = tpu.matmul %47, %49, %cst_30 {dimension_numbers = #tpu.dot_dimension_numbers<[1], [0], [0], [1], [0, 0, 1, 1], [], []>} : vector<8x128xbf16>, vector<128x128xbf16>, vector<8x128xf32> -> vector<8x128xf32>
    %c4_31 = arith.constant 4 : index
    %c0_32 = arith.constant 0 : index
    %51 = vector.load %arg3[%c4_31, %c0_32] : memref<8x128xf32, #tpu.memory_space<vmem>>, vector<1x128xf32>
    %52 = vector.broadcast %51 : vector<1x128xf32> to vector<8x128xf32>
    %53 = arith.addf %50, %52 : vector<8x128xf32>
    %cst_33 = arith.constant 0.000000e+00 : f32
    %54 = vector.broadcast %cst_33 : f32 to vector<8x128xf32>
    %55 = arith.maximumf %53, %54 : vector<8x128xf32>
    %56 = arith.truncf %55 : vector<8x128xf32> to vector<8x128xbf16>
    %c5 = arith.constant 5 : index
    %c0_34 = arith.constant 0 : index
    %c0_35 = arith.constant 0 : index
    %57 = vector.load %arg2[%c5, %c0_34, %c0_35] : memref<8x128x128xbf16, #tpu.memory_space<vmem>>, vector<1x128x128xbf16>
    %58 = vector.shape_cast %57 : vector<1x128x128xbf16> to vector<128x128xbf16>
    %cst_36 = arith.constant dense<0.000000e+00> : vector<8x128xf32>
    %59 = tpu.matmul %56, %58, %cst_36 {dimension_numbers = #tpu.dot_dimension_numbers<[1], [0], [0], [1], [0, 0, 1, 1], [], []>} : vector<8x128xbf16>, vector<128x128xbf16>, vector<8x128xf32> -> vector<8x128xf32>
    %c5_37 = arith.constant 5 : index
    %c0_38 = arith.constant 0 : index
    %60 = vector.load %arg3[%c5_37, %c0_38] : memref<8x128xf32, #tpu.memory_space<vmem>>, vector<1x128xf32>
    %61 = vector.broadcast %60 : vector<1x128xf32> to vector<8x128xf32>
    %62 = arith.addf %59, %61 : vector<8x128xf32>
    %cst_39 = arith.constant 0.000000e+00 : f32
    %63 = vector.broadcast %cst_39 : f32 to vector<8x128xf32>
    %64 = arith.maximumf %62, %63 : vector<8x128xf32>
    %65 = arith.truncf %64 : vector<8x128xf32> to vector<8x128xbf16>
    %c6 = arith.constant 6 : index
    %c0_40 = arith.constant 0 : index
    %c0_41 = arith.constant 0 : index
    %66 = vector.load %arg2[%c6, %c0_40, %c0_41] : memref<8x128x128xbf16, #tpu.memory_space<vmem>>, vector<1x128x128xbf16>
    %67 = vector.shape_cast %66 : vector<1x128x128xbf16> to vector<128x128xbf16>
    %cst_42 = arith.constant dense<0.000000e+00> : vector<8x128xf32>
    %68 = tpu.matmul %65, %67, %cst_42 {dimension_numbers = #tpu.dot_dimension_numbers<[1], [0], [0], [1], [0, 0, 1, 1], [], []>} : vector<8x128xbf16>, vector<128x128xbf16>, vector<8x128xf32> -> vector<8x128xf32>
    %c6_43 = arith.constant 6 : index
    %c0_44 = arith.constant 0 : index
    %69 = vector.load %arg3[%c6_43, %c0_44] : memref<8x128xf32, #tpu.memory_space<vmem>>, vector<1x128xf32>
    %70 = vector.broadcast %69 : vector<1x128xf32> to vector<8x128xf32>
    %71 = arith.addf %68, %70 : vector<8x128xf32>
    %cst_45 = arith.constant 0.000000e+00 : f32
    %72 = vector.broadcast %cst_45 : f32 to vector<8x128xf32>
    %73 = arith.maximumf %71, %72 : vector<8x128xf32>
    %74 = arith.truncf %73 : vector<8x128xf32> to vector<8x128xbf16>
    %c7 = arith.constant 7 : index
    %c0_46 = arith.constant 0 : index
    %c0_47 = arith.constant 0 : index
    %75 = vector.load %arg2[%c7, %c0_46, %c0_47] : memref<8x128x128xbf16, #tpu.memory_space<vmem>>, vector<1x128x128xbf16>
    %76 = vector.shape_cast %75 : vector<1x128x128xbf16> to vector<128x128xbf16>
    %cst_48 = arith.constant dense<0.000000e+00> : vector<8x128xf32>
    %77 = tpu.matmul %74, %76, %cst_48 {dimension_numbers = #tpu.dot_dimension_numbers<[1], [0], [0], [1], [0, 0, 1, 1], [], []>} : vector<8x128xbf16>, vector<128x128xbf16>, vector<8x128xf32> -> vector<8x128xf32>
    %c7_49 = arith.constant 7 : index
    %c0_50 = arith.constant 0 : index
    %78 = vector.load %arg3[%c7_49, %c0_50] : memref<8x128xf32, #tpu.memory_space<vmem>>, vector<1x128xf32>
    %79 = vector.broadcast %78 : vector<1x128xf32> to vector<8x128xf32>
    %80 = arith.addf %77, %79 : vector<8x128xf32>
    %c0_51 = arith.constant 0 : index
    %c0_52 = arith.constant 0 : index
    %81 = vector.load %arg4[%c0_51, %c0_52] : memref<8x128xf32, #tpu.memory_space<vmem>>, vector<8x128xf32>
    tpu.vector_store %arg4[%c0_51, %c0_52], %80 {strides = array<i32>} : memref<8x128xf32, #tpu.memory_space<vmem>>, vector<8x128xf32>,
    return
  }
  func.func @transform_0(%arg0: i32) -> (i32, i32) {
    %c0_i32 = arith.constant 0 : i32
    %c0_i32_0 = arith.constant 0 : i32
    return %arg0, %c0_i32 : i32, i32
  }
  func.func @transform_1(%arg0: i32) -> (i32, i32, i32) {
    %c0_i32 = arith.constant 0 : i32
    %c0_i32_0 = arith.constant 0 : i32
    %c0_i32_1 = arith.constant 0 : i32
    %c0_i32_2 = arith.constant 0 : i32
    return %c0_i32, %c0_i32_0, %c0_i32_1 : i32, i32, i32
  }
  func.func @transform_2(%arg0: i32) -> (i32, i32) {
    %c0_i32 = arith.constant 0 : i32
    %c0_i32_0 = arith.constant 0 : i32
    %c0_i32_1 = arith.constant 0 : i32
    return %c0_i32, %c0_i32_0 : i32, i32
  }
  func.func @transform_3(%arg0: i32) -> (i32, i32) {
    %c0_i32 = arith.constant 0 : i32
    %c0_i32_0 = arith.constant 0 : i32
    return %arg0, %c0_i32 : i32, i32
  }
}

</mosaic_0001>

<bundles_post_ra>
// kernel: tpu_custom_call.1
= control target key start
LH: loop header
LB: loop body
LE: loop exit
PB: predicated region body
PF: predicated region fallthrough
CT: control target
= control target key end

     0   :  { %8 = vsyncpa [#allocation3], 0  ;;  %s1600_s0 = inlined_call_operand.hbm [shape: f32[8,128], index: 0, kind: input, shape index: {}]   ;;  %s1601_s1 = inlined_call_operand.hbm [shape: bf16[8,128,128], index: 1, kind: input, shape index: {}]   ;;  %s1602_s2 = inlined_call_operand.hbm [shape: f32[8,128], index: 2, kind: input, shape index: {}]   ;;  %s1603_s3 = inlined_call_operand.hbm [shape: f32[8,128], index: 3, kind: output, shape index: {}]  }
   0x1   :  { %9 = vsyncpa [#allocation6], 0 }
   0x2   :  { %10 = vsyncpa [#allocation4], 0  ;;  %s1444_s12 = smov [#allocation5]   ;;  %s1350_s16 = scalar_lea.hbm %s1601_s1, 8192 }
   0x3   :  { %s26_s13 = sshll.u32 %s1444_s12, 4  ;;  %p1351_p0 = scmp.ne.s32.totalorder %s1601_s1, %s1350_s16  ;;  %s27_s13 = int_to_ptr.vmem [resolvable:$true] %s26_s13 }
   0x4   :  { %p1354_p1 = scmp.lt.u32.totalorder %s1350_s16, %s1601_s1 }
   0x6   :  { %p1356_p2 = pnand %p1354_p1, %p1351_p0 }
   0x8   :  { %1359 = shalt.err (!%p1356_p2)
}
   0x9   :  { %s1360_s21 = scalar_lea.vmem %s27_s13, 8192  ;;  %p1365_p4 = scmp.lt.s32.totalorder %s27_s13, %s27_s13 }
   0xa   :  { %p1361_p3 = scmp.ne.s32.totalorder %s27_s13, %s1360_s21  ;;  %p1366_p5 = scmp.lt.s32.totalorder %s1360_s21, %s1360_s21 }
   0xc   :  { %p1367_p6 = por %p1366_p5, %p1365_p4 }
   0xe   :  { %p1368_p7 = pnand %p1367_p6, %p1361_p3 }
  0x10   :  { %1371 = shalt.err (!%p1368_p7)
}
  0x11   :  { %s1445_s22 = smov 64   ;;  %s1446_s23 = smov 4  }
  0x12   :  { %32 = dma.hbm_to_vmem [thread:$0]  %s1601_s1, 8192, %s27_s13, [#allocation6], %s1445_s22, %s1445_s22, %s1446_s23  }
  0x13   :  { %s1447_s26 = smov [#allocation2]   ;;  %s1448_s28 = smov [#allocation7]  }
  0x14   :  { %s17_s27 = sshll.u32 %s1447_s26, 4  ;;  %s39_s29 = sshll.u32 %s1448_s28, 4  ;;  %s18_s27 = int_to_ptr.vmem [resolvable:$true] %s17_s27  ;;  %s40_s29 = int_to_ptr.vmem [resolvable:$true] %s39_s29 }
  0x15   :  { %s1372_s5 = scalar_lea.hbm %s1600_s0, 128 }
  0x16   :  { %p1373_p8 = scmp.ne.s32.totalorder %s1600_s0, %s1372_s5  ;;  %p1376_p9 = scmp.lt.u32.totalorder %s1372_s5, %s1600_s0 }
  0x18   :  { %p1378_p10 = pnand %p1376_p9, %p1373_p8 }
  0x1a   :  { %1381 = shalt.err (!%p1378_p10)
}
  0x1b   :  { %s1382_s1 = scalar_lea.vmem %s18_s27, 128  ;;  %p1387_p12 = scmp.lt.s32.totalorder %s18_s27, %s18_s27 }
  0x1c   :  { %p1383_p11 = scmp.ne.s32.totalorder %s18_s27, %s1382_s1  ;;  %p1388_p13 = scmp.lt.s32.totalorder %s1382_s1, %s1382_s1 }
  0x1e   :  { %p1389_p0 = por %p1388_p13, %p1387_p12 }
  0x20   :  { %p1390_p1 = pnand %p1389_p0, %p1383_p11 }
  0x22   :  { %1393 = shalt.err (!%p1390_p1)
}
  0x23   :  { %20 = dma.hbm_to_vmem [thread:$0]  %s1600_s0, 128, %s18_s27, [#allocation3]  }
  0x24   :  { %s1394_s14 = scalar_lea.hbm %s1602_s2, 128 }
  0x25   :  { %p1395_p2 = scmp.ne.s32.totalorder %s1602_s2, %s1394_s14  ;;  %p1398_p3 = scmp.lt.u32.totalorder %s1394_s14, %s1602_s2 }
  0x27   :  { %p1400_p4 = pnand %p1398_p3, %p1395_p2 }
  0x29   :  { %1403 = shalt.err (!%p1400_p4)
}
  0x2a   :  { %s1404_s19 = scalar_lea.vmem %s40_s29, 128  ;;  %p1409_p6 = scmp.lt.s32.totalorder %s40_s29, %s40_s29 }
  0x2b   :  { %p1405_p5 = scmp.ne.s32.totalorder %s40_s29, %s1404_s19  ;;  %p1410_p7 = scmp.lt.s32.totalorder %s1404_s19, %s1404_s19 }
  0x2d   :  { %p1411_p8 = por %p1410_p7, %p1409_p6 }
  0x2f   :  { %p1412_p9 = pnand %p1411_p8, %p1405_p5 }
  0x31   :  { %1415 = shalt.err (!%p1412_p9)
}
  0x32   :  { %42 = dma.hbm_to_vmem [thread:$0]  %s1602_s2, 128, %s40_s29, [#allocation6]  }
  0x33   :  { %1438 = dma.done.wait [#allocation3], 128  }
  0x34   :  { %1439 = vsyncadd [#allocation3], 4294967168 }
  0x35   :  { %1440 = dma.done.wait [#allocation6], 8320  }
  0x36   :  { %1441 = vsyncadd [#allocation6], 4294958976  ;;  %v1449_v0 = vmov 0.0   ;;  %v53_v1 = vld [vmem:[#allocation2] sm:$0xff]  ;;  %v1284_v3 = vld [vmem:[#allocation5] sm:$0xff]   ;;  %vm1450_vm0 = vmmov 0  }
  0x37   :  { %1116 = vmatprep.subr.bf16.mxu0 %v1449_v0  ;;  %1136 = vmatprep.subr.bf16.mxu1 %v1449_v0  ;;  %v54_v2 = vmul.f32 %v53_v1, %v53_v1  ;;  %v1285_v4 = vld [vmem:[#allocation5 + $0x8] sm:$0xff]   ;;  %v1286_v5 = vld [vmem:[#allocation5 + $0x10] sm:$0xff]   ;;  %v1287_v6 = vld [vmem:[#allocation5 + $0x18] sm:$0xff]   ;;  %s1451_s2 = smov [#allocation8]  }
  0x38   :  { %1117 = vmatpush3.bf16.msra.mxu0 %v1284_v3  ;;  %v1288_v7 = vld [vmem:[#allocation5 + $0x20] sm:$0xff]   ;;  %v1289_v8 = vld [vmem:[#allocation5 + $0x28] sm:$0xff]   ;;  %1132 = vmatprep.mubr.msk.bf16.mxu0 %vm1450_vm0, %v1449_v0  ;;  %v1290_v9 = vld [vmem:[#allocation5 + $0x30] sm:$0xff]   ;;  %s962_s21 = sshll.u32 %s1451_s2, 4  ;;  %s963_s21 = int_to_ptr.vmem [resolvable:$true] %s962_s21 }
  0x39   :  { %55 = vadd.xlane.f32.xlu0 %v54_v2  ;;  %1118 = vmatprep.subr.bf16.mxu0 %v1449_v0  ;;  %v1291_v10 = vld [vmem:[#allocation5 + $0x38] sm:$0xff]   ;;  %v1292_v11 = vld [vmem:[#allocation5 + $0x40] sm:$0xff]   ;;  %v1293_v12 = vld [vmem:[#allocation5 + $0x48] sm:$0xff]   ;;  %s1416_s22 = scalar_lea.vmem %s963_s21, 128  ;;  %p1421_p11 = scmp.lt.s32.totalorder %s963_s21, %s963_s21 }
  0x3a   :  { %1152 = vmatprep.mubr.msk.bf16.mxu1 %vm1450_vm0, %v1449_v0  ;;  %1137 = vmatpush3.bf16.msra.mxu1 %v1292_v11  ;;  %v1294_v13 = vld [vmem:[#allocation5 + $0x50] sm:$0xff]   ;;  %v1295_v14 = vld [vmem:[#allocation5 + $0x58] sm:$0xff]   ;;  %v1296_v15 = vld [vmem:[#allocation5 + $0x60] sm:$0xff]   ;;  %p1417_p10 = scmp.ne.s32.totalorder %s963_s21, %s1416_s22  ;;  %p1422_p12 = scmp.lt.s32.totalorder %s1416_s22, %s1416_s22 }
  0x3b   :  { %1138 = vmatprep.subr.bf16.mxu1 %v1449_v0  ;;  %v1297_v16 = vld [vmem:[#allocation5 + $0x68] sm:$0xff]   ;;  %v1298_v23 = vld [vmem:[#allocation5 + $0x70] sm:$0xff]   ;;  %v1299_v24 = vld [vmem:[#allocation5 + $0x78] sm:$0xff]  }
  0x3c   :  { %1119 = vmatpush3.bf16.msra.mxu0 %v1285_v4  ;;  %v1300_v25 = vld [vmem:[#allocation5 + $0x80] sm:$0xff]   ;;  %v1301_v26 = vld [vmem:[#allocation5 + $0x88] sm:$0xff]   ;;  %v1302_v27 = vld [vmem:[#allocation5 + $0x90] sm:$0xff]   ;;  %p1423_p13 = por %p1422_p12, %p1421_p11 }
  0x3d   :  { %1120 = vmatprep.subr.bf16.mxu0 %v1449_v0  ;;  %v1303_v28 = vld [vmem:[#allocation5 + $0x98] sm:$0xff]   ;;  %v1304_v29 = vld [vmem:[#allocation5 + $0xa0] sm:$0xff]   ;;  %v1305_v30 = vld [vmem:[#allocation5 + $0xa8] sm:$0xff]  }
  0x3e   :  { %1139 = vmatpush3.bf16.msra.mxu1 %v1293_v12  ;;  %v972_v31 = vld [vmem:[#allocation7] ss:$0 sm:$0xff]  ;;  %v1306_v39 = vld [vmem:[#allocation5 + $0xb0] sm:$0xff]   ;;  %v1307_v40 = vld [vmem:[#allocation5 + $0xb8] sm:$0xff]   ;;  %p1424_p0 = pnand %p1423_p13, %p1417_p10 }
  0x3f   :  { %1140 = vmatprep.subr.bf16.mxu1 %v1449_v0  ;;  %v1308_v41 = vld [vmem:[#allocation5 + $0xc0] sm:$0xff]   ;;  %v1309_v42 = vld [vmem:[#allocation5 + $0xc8] sm:$0xff]   ;;  %v1310_v43 = vld [vmem:[#allocation5 + $0xd0] sm:$0xff]  }
  0x40   :  { %1121 = vmatpush3.bf16.msra.mxu0 %v1286_v5  ;;  %v1311_v44 = vld [vmem:[#allocation5 + $0xd8] sm:$0xff]   ;;  %v1312_v45 = vld [vmem:[#allocation5 + $0xe0] sm:$0xff]   ;;  %v1313_v46 = vld [vmem:[#allocation5 + $0xe8] sm:$0xff]  }
  0x41   :  { %1122 = vmatprep.subr.bf16.mxu0 %v1449_v0  ;;  %v981_v47 = vld [vmem:[#allocation7 + $0x1] ss:$0 sm:$0xff]  ;;  %v1314_v55 = vld [vmem:[#allocation5 + $0xf0] sm:$0xff]   ;;  %v1315_v56 = vld [vmem:[#allocation5 + $0xf8] sm:$0xff]  }
  0x42   :  { %1141 = vmatpush3.bf16.msra.mxu1 %v1294_v13  ;;  %v1316_v57 = vld [vmem:[#allocation5 + $0x100] sm:$0xff]   ;;  %v1317_v58 = vld [vmem:[#allocation5 + $0x108] sm:$0xff]   ;;  %v1318_v59 = vld [vmem:[#allocation5 + $0x110] sm:$0xff]  }
  0x43   :  { %1142 = vmatprep.subr.bf16.mxu1 %v1449_v0  ;;  %v1319_v60 = vld [vmem:[#allocation5 + $0x118] sm:$0xff]   ;;  %v1320_v61 = vld [vmem:[#allocation5 + $0x120] sm:$0xff]   ;;  %v1321_v62 = vld [vmem:[#allocation5 + $0x128] sm:$0xff]  }
  0x44   :  { %1123 = vmatpush3.bf16.msra.mxu0 %v1287_v6  ;;  %v990_v63 = vld [vmem:[#allocation7 + $0x2] ss:$0 sm:$0xff]  ;;  %v1325_v11 = vld [vmem:[#allocation5 + $0x148] sm:$0xff]   ;;  %v1326_v12 = vld [vmem:[#allocation5 + $0x150] sm:$0xff]  }
  0x45   :  { %1124 = vmatprep.subr.bf16.mxu0 %v1449_v0  ;;  %v1327_v13 = vld [vmem:[#allocation5 + $0x158] sm:$0xff]  }
  0x46   :  { %1143 = vmatpush3.bf16.msra.mxu1 %v1295_v14  ;;  %v1328_v14 = vld [vmem:[#allocation5 + $0x160] sm:$0xff]  }
  0x47   :  { %1144 = vmatprep.subr.bf16.mxu1 %v1449_v0 }
  0x48   :  { %1125 = vmatpush3.bf16.msra.mxu0 %v1288_v7 }
  0x49   :  { %1126 = vmatprep.subr.bf16.mxu0 %v1449_v0 }
  0x4a   :  { %1145 = vmatpush3.bf16.msra.mxu1 %v1296_v15  ;;  %v1329_v15 = vld [vmem:[#allocation5 + $0x168] sm:$0xff]  }
  0x4b   :  { %1146 = vmatprep.subr.bf16.mxu1 %v1449_v0 }
  0x4c   :  { %1127 = vmatpush3.bf16.msra.mxu0 %v1289_v8  ;;  %v1322_v8 = vld [vmem:[#allocation5 + $0x130] sm:$0xff]  }
  0x4d   :  { %1128 = vmatprep.subr.bf16.mxu0 %v1449_v0 }
  0x4e   :  { %1147 = vmatpush3.bf16.msra.mxu1 %v1297_v16  ;;  %v999_v16 = vld [vmem:[#allocation7 + $0x3] ss:$0 sm:$0xff] }
  0x4f   :  { %1148 = vmatprep.subr.bf16.mxu1 %v1449_v0 }
  0x50   :  { %1129 = vmatpush3.bf16.msra.mxu0 %v1290_v9  ;;  %v1323_v9 = vld [vmem:[#allocation5 + $0x138] sm:$0xff]  }
  0x51   :  { %1130 = vmatprep.subr.bf16.mxu0 %v1449_v0 }
  0x52   :  { %1149 = vmatpush3.bf16.msra.mxu1 %v1298_v23 }
  0x53   :  { %1150 = vmatprep.subr.bf16.mxu1 %v1449_v0 }
  0x54   :  { %1131 = vmatpush3.bf16.msra.mxu0 %v1291_v10  ;;  %v1324_v10 = vld [vmem:[#allocation5 + $0x140] sm:$0xff]  }
  0x55   :  { %1156 = vmatprep.subr.bf16.mxu0 %v1449_v0 }
  0x56   :  { %1151 = vmatpush3.bf16.msra.mxu1 %v1299_v24  ;;  %v1330_v24 = vld [vmem:[#allocation5 + $0x170] sm:$0xff]  }
  0x57   :  { %1176 = vmatprep.subr.bf16.mxu1 %v1449_v0 }
  0xc6   :  { %v56_v17 = vpop.xlane.xlu0 %55 }
  0xc7   :  { %v57_v18 = vmul.f32 0.03125, %v56_v17 }
  0xc9   :  { %v58_v19 = vadd.f32 1e-08, %v57_v18 }
  0xcb   :  { %1348 = vrsqrt.f32 %v58_v19 }
  0xd5   :  { %v1349_v20 = vpop.eup %1348 }
  0xd6   :  { %v60_v21 = vmul.f32 %v1349_v20, %v53_v1 }
  0xd8   :  { %v61_v22 = vpack.c.bf16 %v60_v21, %v60_v21 }
  0xda   :  { %1133 = vmatmul.mubr.bf16.vlgmr.msra.gmra.mrb[0].mxu0 %v61_v22 }
  0xdb   :  { %1172 = vmatprep.mubr.msk.bf16.mxu0 %vm1450_vm0, %v1449_v0  ;;  %1157 = vmatpush3.bf16.msra.mxu0 %v1300_v25  ;;  %v1331_v25 = vld [vmem:[#allocation5 + $0x178] sm:$0xff]  }
  0xdc   :  { %1158 = vmatprep.subr.bf16.mxu0 %v1449_v0 }
  0xdf   :  { %1159 = vmatpush3.bf16.msra.mxu0 %v1301_v26  ;;  %v1332_v26 = vld [vmem:[#allocation5 + $0x180] sm:$0xff]  }
  0xe0   :  { %1160 = vmatprep.subr.bf16.mxu0 %v1449_v0 }
  0xe3   :  { %1161 = vmatpush3.bf16.msra.mxu0 %v1302_v27  ;;  %v1333_v27 = vld [vmem:[#allocation5 + $0x188] sm:$0xff]  }
  0xe4   :  { %1162 = vmatprep.subr.bf16.mxu0 %v1449_v0 }
  0xe7   :  { %1163 = vmatpush3.bf16.msra.mxu0 %v1303_v28  ;;  %v1334_v28 = vld [vmem:[#allocation5 + $0x190] sm:$0xff]  }
  0xe8   :  { %1164 = vmatprep.subr.bf16.mxu0 %v1449_v0 }
  0xeb   :  { %1165 = vmatpush3.bf16.msra.mxu0 %v1304_v29  ;;  %v1335_v29 = vld [vmem:[#allocation5 + $0x198] sm:$0xff]  }
  0xec   :  { %1166 = vmatprep.subr.bf16.mxu0 %v1449_v0 }
  0xef   :  { %1167 = vmatpush3.bf16.msra.mxu0 %v1305_v30  ;;  %v1336_v30 = vld [vmem:[#allocation5 + $0x1a0] sm:$0xff]  }
  0xf0   :  { %1168 = vmatprep.subr.bf16.mxu0 %v1449_v0 }
  0xf3   :  { %1169 = vmatpush3.bf16.msra.mxu0 %v1306_v39 }
  0xf4   :  { %1170 = vmatprep.subr.bf16.mxu0 %v1449_v0 }
  0xf7   :  { %1171 = vmatpush3.bf16.msra.mxu0 %v1307_v40  ;;  %v1338_v40 = vld [vmem:[#allocation5 + $0x1b0] sm:$0xff]  }
  0xf8   :  { %1196 = vmatprep.subr.bf16.mxu0 %v1449_v0 }
 0x1ad   :  { %v165_v32 = vpop.f32.mrb[0].mxu0 }
 0x1ae   :  { %v166_v33 = vadd.f32 %v972_v31, %v165_v32  ;;  %v1134_v34 = vpop.f32.mrb[1].mxu0  ;;  %v1337_v31 = vld [vmem:[#allocation5 + $0x1a8] sm:$0xff]   ;;  %v1008_v32 = vld [vmem:[#allocation7 + $0x4] ss:$0 sm:$0xff] }
 0x1af   :  { %v168_v35 = vpop.f32.mrb[2].mxu0 }
 0x1b0   :  { %v171_v36 = vmax.f32 %v166_v33, 0.0  ;;  %v1135_v37 = vpop.f32.mrb[3].mxu0 }
 0x1b2   :  { %v172_v38 = vpack.c.bf16 %v171_v36, %v171_v36 }
 0x1b4   :  { %1153 = vmatmul.mubr.bf16.vlgmr.msra.gmra.mrb[0].mxu1 %v172_v38 }
 0x1b5   :  { %1192 = vmatprep.mubr.msk.bf16.mxu1 %vm1450_vm0, %v1449_v0  ;;  %1177 = vmatpush3.bf16.msra.mxu1 %v1308_v41  ;;  %v1339_v41 = vld [vmem:[#allocation5 + $0x1b8] sm:$0xff]  }
 0x1b6   :  { %1178 = vmatprep.subr.bf16.mxu1 %v1449_v0 }
 0x1b9   :  { %1179 = vmatpush3.bf16.msra.mxu1 %v1309_v42  ;;  %v1340_v42 = vld [vmem:[#allocation5 + $0x1c0] sm:$0xff]  }
 0x1ba   :  { %1180 = vmatprep.subr.bf16.mxu1 %v1449_v0 }
 0x1bd   :  { %1181 = vmatpush3.bf16.msra.mxu1 %v1310_v43  ;;  %v1341_v43 = vld [vmem:[#allocation5 + $0x1c8] sm:$0xff]  }
 0x1be   :  { %1182 = vmatprep.subr.bf16.mxu1 %v1449_v0 }
 0x1c1   :  { %1183 = vmatpush3.bf16.msra.mxu1 %v1311_v44  ;;  %v1342_v44 = vld [vmem:[#allocation5 + $0x1d0] sm:$0xff]  }
 0x1c2   :  { %1184 = vmatprep.subr.bf16.mxu1 %v1449_v0 }
 0x1c5   :  { %1185 = vmatpush3.bf16.msra.mxu1 %v1312_v45  ;;  %v1343_v45 = vld [vmem:[#allocation5 + $0x1d8] sm:$0xff]  }
 0x1c6   :  { %1186 = vmatprep.subr.bf16.mxu1 %v1449_v0 }
 0x1c9   :  { %1187 = vmatpush3.bf16.msra.mxu1 %v1313_v46  ;;  %v1344_v46 = vld [vmem:[#allocation5 + $0x1e0] sm:$0xff]  }
 0x1ca   :  { %1188 = vmatprep.subr.bf16.mxu1 %v1449_v0 }
 0x1cd   :  { %1189 = vmatpush3.bf16.msra.mxu1 %v1314_v55 }
 0x1ce   :  { %1190 = vmatprep.subr.bf16.mxu1 %v1449_v0 }
 0x1d1   :  { %1191 = vmatpush3.bf16.msra.mxu1 %v1315_v56  ;;  %v1346_v56 = vld [vmem:[#allocation5 + $0x1f0] sm:$0xff]  }
 0x1d2   :  { %1216 = vmatprep.subr.bf16.mxu1 %v1449_v0 }
 0x287   :  { %v277_v48 = vpop.f32.mrb[0].mxu1 }
 0x288   :  { %v278_v49 = vadd.f32 %v981_v47, %v277_v48  ;;  %v1154_v50 = vpop.f32.mrb[1].mxu1  ;;  %v1345_v47 = vld [vmem:[#allocation5 + $0x1e8] sm:$0xff]   ;;  %v1017_v48 = vld [vmem:[#allocation7 + $0x5] ss:$0 sm:$0xff] }
 0x289   :  { %v280_v51 = vpop.f32.mrb[2].mxu1 }
 0x28a   :  { %v283_v52 = vmax.f32 %v278_v49, 0.0  ;;  %v1155_v53 = vpop.f32.mrb[3].mxu1 }
 0x28c   :  { %v284_v54 = vpack.c.bf16 %v283_v52, %v283_v52 }
 0x28e   :  { %1173 = vmatmul.mubr.bf16.vlgmr.msra.gmra.mrb[4].mxu0 %v284_v54 }
 0x28f   :  { %1212 = vmatprep.mubr.msk.bf16.mxu0 %vm1450_vm0, %v1449_v0  ;;  %1197 = vmatpush3.bf16.msra.mxu0 %v1316_v57  ;;  %v1347_v57 = vld [vmem:[#allocation5 + $0x1f8] sm:$0xff]  }
 0x290   :  { %1198 = vmatprep.subr.bf16.mxu0 %v1449_v0 }
 0x293   :  { %1199 = vmatpush3.bf16.msra.mxu0 %v1317_v58  ;;  %v1026_v58 = vld [vmem:[#allocation7 + $0x6] ss:$0 sm:$0xff] }
 0x294   :  { %1200 = vmatprep.subr.bf16.mxu0 %v1449_v0 }
 0x297   :  { %1201 = vmatpush3.bf16.msra.mxu0 %v1318_v59 }
 0x298   :  { %1202 = vmatprep.subr.bf16.mxu0 %v1449_v0 }
 0x29b   :  { %1203 = vmatpush3.bf16.msra.mxu0 %v1319_v60 }
 0x29c   :  { %1204 = vmatprep.subr.bf16.mxu0 %v1449_v0 }
 0x29f   :  { %1205 = vmatpush3.bf16.msra.mxu0 %v1320_v61 }
 0x2a0   :  { %1206 = vmatprep.subr.bf16.mxu0 %v1449_v0 }
 0x2a3   :  { %1207 = vmatpush3.bf16.msra.mxu0 %v1321_v62 }
 0x2a4   :  { %1208 = vmatprep.subr.bf16.mxu0 %v1449_v0 }
 0x2a7   :  { %1209 = vmatpush3.bf16.msra.mxu0 %v1322_v8 }
 0x2a8   :  { %1210 = vmatprep.subr.bf16.mxu0 %v1449_v0 }
 0x2ab   :  { %1211 = vmatpush3.bf16.msra.mxu0 %v1323_v9 }
 0x2ac   :  { %1236 = vmatprep.subr.bf16.mxu0 %v1449_v0 }
 0x361   :  { %v389_v1 = vpop.f32.mrb[4].mxu0 }
 0x362   :  { %v390_v2 = vadd.f32 %v990_v63, %v389_v1  ;;  %v1174_v3 = vpop.f32.mrb[5].mxu0 }
 0x363   :  { %v392_v4 = vpop.f32.mrb[6].mxu0  ;;  %v1035_v3 = vld [vmem:[#allocation7 + $0x7] ss:$0 sm:$0xff] }
 0x364   :  { %v395_v5 = vmax.f32 %v390_v2, 0.0  ;;  %v1175_v6 = vpop.f32.mrb[7].mxu0 }
 0x366   :  { %v396_v7 = vpack.c.bf16 %v395_v5, %v395_v5 }
 0x368   :  { %1193 = vmatmul.mubr.bf16.vlgmr.msra.gmra.mrb[4].mxu1 %v396_v7 }
 0x369   :  { %1232 = vmatprep.mubr.msk.bf16.mxu1 %vm1450_vm0, %v1449_v0  ;;  %1217 = vmatpush3.bf16.msra.mxu1 %v1324_v10 }
 0x36a   :  { %1218 = vmatprep.subr.bf16.mxu1 %v1449_v0 }
 0x36d   :  { %1219 = vmatpush3.bf16.msra.mxu1 %v1325_v11 }
 0x36e   :  { %1220 = vmatprep.subr.bf16.mxu1 %v1449_v0 }
 0x371   :  { %1221 = vmatpush3.bf16.msra.mxu1 %v1326_v12 }
 0x372   :  { %1222 = vmatprep.subr.bf16.mxu1 %v1449_v0 }
 0x375   :  { %1223 = vmatpush3.bf16.msra.mxu1 %v1327_v13 }
 0x376   :  { %1224 = vmatprep.subr.bf16.mxu1 %v1449_v0 }
 0x379   :  { %1225 = vmatpush3.bf16.msra.mxu1 %v1328_v14 }
 0x37a   :  { %1226 = vmatprep.subr.bf16.mxu1 %v1449_v0 }
 0x37d   :  { %1227 = vmatpush3.bf16.msra.mxu1 %v1329_v15 }
 0x37e   :  { %1228 = vmatprep.subr.bf16.mxu1 %v1449_v0 }
 0x381   :  { %1229 = vmatpush3.bf16.msra.mxu1 %v1330_v24 }
 0x382   :  { %1230 = vmatprep.subr.bf16.mxu1 %v1449_v0 }
 0x385   :  { %1231 = vmatpush3.bf16.msra.mxu1 %v1331_v25 }
 0x386   :  { %1256 = vmatprep.subr.bf16.mxu1 %v1449_v0 }
 0x43b   :  { %v501_v17 = vpop.f32.mrb[4].mxu1 }
 0x43c   :  { %v502_v18 = vadd.f32 %v999_v16, %v501_v17  ;;  %v1194_v19 = vpop.f32.mrb[5].mxu1 }
 0x43d   :  { %v504_v20 = vpop.f32.mrb[6].mxu1 }
 0x43e   :  { %v507_v21 = vmax.f32 %v502_v18, 0.0  ;;  %v1195_v22 = vpop.f32.mrb[7].mxu1 }
 0x440   :  { %v508_v23 = vpack.c.bf16 %v507_v21, %v507_v21 }
 0x442   :  { %1213 = vmatmul.mubr.bf16.vlgmr.msra.gmra.mrb[8].mxu0 %v508_v23 }
 0x443   :  { %1252 = vmatprep.mubr.msk.bf16.mxu0 %vm1450_vm0, %v1449_v0  ;;  %1237 = vmatpush3.bf16.msra.mxu0 %v1332_v26 }
 0x444   :  { %1238 = vmatprep.subr.bf16.mxu0 %v1449_v0 }
 0x447   :  { %1239 = vmatpush3.bf16.msra.mxu0 %v1333_v27 }
 0x448   :  { %1240 = vmatprep.subr.bf16.mxu0 %v1449_v0 }
 0x44b   :  { %1241 = vmatpush3.bf16.msra.mxu0 %v1334_v28 }
 0x44c   :  { %1242 = vmatprep.subr.bf16.mxu0 %v1449_v0 }
 0x44f   :  { %1243 = vmatpush3.bf16.msra.mxu0 %v1335_v29 }
 0x450   :  { %1244 = vmatprep.subr.bf16.mxu0 %v1449_v0 }
 0x453   :  { %1245 = vmatpush3.bf16.msra.mxu0 %v1336_v30 }
 0x454   :  { %1246 = vmatprep.subr.bf16.mxu0 %v1449_v0 }
 0x457   :  { %1247 = vmatpush3.bf16.msra.mxu0 %v1337_v31 }
 0x458   :  { %1248 = vmatprep.subr.bf16.mxu0 %v1449_v0 }
 0x45b   :  { %1249 = vmatpush3.bf16.msra.mxu0 %v1338_v40 }
 0x45c   :  { %1250 = vmatprep.subr.bf16.mxu0 %v1449_v0 }
 0x45f   :  { %1251 = vmatpush3.bf16.msra.mxu0 %v1339_v41 }
 0x515   :  { %v613_v33 = vpop.f32.mrb[8].mxu0 }
 0x516   :  { %v614_v34 = vadd.f32 %v1008_v32, %v613_v33  ;;  %v1214_v35 = vpop.f32.mrb[9].mxu0 }
 0x517   :  { %v616_v36 = vpop.f32.mrb[10].mxu0 }
 0x518   :  { %v619_v37 = vmax.f32 %v614_v34, 0.0  ;;  %v1215_v38 = vpop.f32.mrb[11].mxu0 }
 0x51a   :  { %v620_v39 = vpack.c.bf16 %v619_v37, %v619_v37 }
 0x51c   :  { %1233 = vmatmul.mubr.bf16.vlgmr.msra.gmra.mrb[8].mxu1 %v620_v39 }
 0x51d   :  { %1272 = vmatprep.mubr.msk.bf16.mxu1 %vm1450_vm0, %v1449_v0  ;;  %1257 = vmatpush3.bf16.msra.mxu1 %v1340_v42 }
 0x51e   :  { %1258 = vmatprep.subr.bf16.mxu1 %v1449_v0 }
 0x521   :  { %1259 = vmatpush3.bf16.msra.mxu1 %v1341_v43 }
 0x522   :  { %1260 = vmatprep.subr.bf16.mxu1 %v1449_v0 }
 0x525   :  { %1261 = vmatpush3.bf16.msra.mxu1 %v1342_v44 }
 0x526   :  { %1262 = vmatprep.subr.bf16.mxu1 %v1449_v0 }
 0x529   :  { %1263 = vmatpush3.bf16.msra.mxu1 %v1343_v45 }
 0x52a   :  { %1264 = vmatprep.subr.bf16.mxu1 %v1449_v0 }
 0x52d   :  { %1265 = vmatpush3.bf16.msra.mxu1 %v1344_v46 }
 0x52e   :  { %1266 = vmatprep.subr.bf16.mxu1 %v1449_v0 }
 0x531   :  { %1267 = vmatpush3.bf16.msra.mxu1 %v1345_v47 }
 0x532   :  { %1268 = vmatprep.subr.bf16.mxu1 %v1449_v0 }
 0x535   :  { %1269 = vmatpush3.bf16.msra.mxu1 %v1346_v56 }
 0x536   :  { %1270 = vmatprep.subr.bf16.mxu1 %v1449_v0 }
 0x539   :  { %1271 = vmatpush3.bf16.msra.mxu1 %v1347_v57 }
 0x5ef   :  { %v725_v49 = vpop.f32.mrb[8].mxu1 }
 0x5f0   :  { %v726_v50 = vadd.f32 %v1017_v48, %v725_v49  ;;  %v1234_v51 = vpop.f32.mrb[9].mxu1 }
 0x5f1   :  { %v728_v52 = vpop.f32.mrb[10].mxu1 }
 0x5f2   :  { %v731_v53 = vmax.f32 %v726_v50, 0.0  ;;  %v1235_v54 = vpop.f32.mrb[11].mxu1 }
 0x5f4   :  { %v732_v55 = vpack.c.bf16 %v731_v53, %v731_v53 }
 0x5f6   :  { %1253 = vmatmul.mubr.bf16.vlgmr.msra.gmra.mrb[12].mxu0 %v732_v55 }
 0x6c9   :  { %v837_v59 = vpop.f32.mrb[12].mxu0 }
 0x6ca   :  { %v838_v60 = vadd.f32 %v1026_v58, %v837_v59  ;;  %v1254_v61 = vpop.f32.mrb[13].mxu0 }
 0x6cb   :  { %v840_v62 = vpop.f32.mrb[14].mxu0 }
 0x6cc   :  { %v843_v63 = vmax.f32 %v838_v60, 0.0  ;;  %v1255_v1 = vpop.f32.mrb[15].mxu0 }
 0x6ce   :  { %v844_v2 = vpack.c.bf16 %v843_v63, %v843_v63 }
 0x6d0   :  { %1273 = vmatmul.mubr.bf16.vlgmr.msra.gmra.mrb[12].mxu1 %v844_v2 }
 0x7a3   :  { %v949_v4 = vpop.f32.mrb[12].mxu1 }
 0x7a4   :  { %v950_v5 = vadd.f32 %v1035_v3, %v949_v4  ;;  %v1274_v6 = vpop.f32.mrb[13].mxu1 }
 0x7a5   :  { %v952_v7 = vpop.f32.mrb[14].mxu1 }
 0x7a6   :  { %955 = vst [vmem:[#allocation8] sm:$0xff] %v950_v5  ;;  %v1275_v0 = vpop.f32.mrb[15].mxu1 }
 0x7a7   :  { %1427 = shalt.err (!%p1424_p0)
}
 0x7a8   :  { %s1428_s25 = scalar_lea.hbm %s1603_s3, 128 }
 0x7a9   :  { %p1429_p1 = scmp.ne.s32.totalorder %s1603_s3, %s1428_s25  ;;  %p1432_p2 = scmp.lt.u32.totalorder %s1428_s25, %s1603_s3 }
 0x7ab   :  { %p1434_p3 = pnand %p1432_p2, %p1429_p1 }
 0x7ad   :  { %1437 = shalt.err (!%p1434_p3)
}
 0x7ae   :  { %965 = dma.vmem_to_hbm [thread:$0]  %s963_s21, 128, %s1603_s3, [#allocation4]  }
 0x7af   :  { %1442 = dma.done.wait [#allocation4], 128  }
 0x7b0   :  { %1443 = vsyncadd [#allocation4], 4294967168 }
 0x7b1   :  { %969 = vsyncpa [#allocation3], 1 }
 0x7b2   :  { %970 = vsyncpa [#allocation6], 1 }
 0x7b3   :  { %971 = vsyncpa [#allocation4], 1 }

</bundles_post_ra>
